<compile_context>
chip_gen: v6e
topology: v6e:2x2x1
jax: 0.10.0
libtpu: 0.0.40
codegen_flags: <defaults>
</compile_context>

<pallas_src>
import jax
import jax.numpy as jnp
from jax.experimental import pallas as pl
from jax.experimental.pallas import tpu as pltpu

# Shapes implied by the module: state_dim chosen = 10 so that the gpytorch
# active_dims (range(state_element_num)) line up with the 10 extracted features.
STATE_DIM = 10
ACTION_DIM = 6
NN_OUT = 10
H1, H2 = 64, 48

# gpytorch defaults: raw params 0.0 -> softplus(0) = log(2)
_SOFTPLUS0 = 0.6931471805599453
RBF_LENGTHSCALE = _SOFTPLUS0   # RBFKernel(ard_num_dims=1) default lengthscale
RBF_OUTPUTSCALE = _SOFTPLUS0   # ScaleKernel default outputscale
LIN_VARIANCE = _SOFTPLUS0      # LinearKernel default variance

_INV_2L2 = 1.0 / (2.0 * RBF_LENGTHSCALE * RBF_LENGTHSCALE)
_SCALE_EPS = 1e-8              # guard for ScaleToBounds (max - min)

FUSED_BATCH_MAX = 256          # single fused kernel for N <= this
MLP_TILE = 256                 # row tile of the gridded MLP kernel


def _pick_covar_tile():
    """256 on v2-v5 (16 MiB default scoped VMEM), 512 on v6e/v7x."""
    try:
        kind = jax.devices()[0].device_kind.lower()
    except Exception:
        return 256
    for tag in ("v2", "v3", "v4", "v5"):
        if tag in kind:
            return 256
    return 512


COVAR_TILE = _pick_covar_tile()


# ---------------------------------------------------------------------------
# Shared compute helpers (traced inside the kernels)
# ---------------------------------------------------------------------------
def _mlp_feats(x, w1, b1, w2, b2, w3, b3):
    """3x (Linear -> tanh)."""
    h = jnp.tanh(jnp.dot(x, w1, preferred_element_type=jnp.float32) + b1)
    h = jnp.tanh(jnp.dot(h, w2, preferred_element_type=jnp.float32) + b2)
    return jnp.tanh(jnp.dot(h, w3, preferred_element_type=jnp.float32) + b3)


def _additive_rbf(feats_rows, feats_cols_t, neg_coef):
    """sum_d exp((f[i,d] - f[j,d])^2 * neg_coef) as a per-dim lane-dense
    accumulation: feats_rows is [Ni, D], feats_cols_t is [D, Nj], neg_coef < 0."""
    n_i = feats_rows.shape[0]
    n_j = feats_cols_t.shape[1]
    acc = jnp.zeros((n_i, n_j), jnp.float32)
    for d in range(NN_OUT):                       # static, fully unrolled (D = 10)
        diff = feats_rows[:, d:d + 1] - feats_cols_t[d:d + 1, :]   # [Ni, Nj]
        acc = acc + jnp.exp((diff * diff) * neg_coef)
    return acc


# ---------------------------------------------------------------------------
# Kernel A (small batch): fused MLP + ScaleToBounds + GP covariance
#   sm_ref = state_multiplier * outputscale, fm_ref = fisher_multiplier * variance
# ---------------------------------------------------------------------------
def _fused_value_kernel(sm_ref, fm_ref, x_ref, w1_ref, b1_ref, w2_ref, b2_ref,
                        w3_ref, b3_ref, fish_ref, fish_t_ref, covar_ref):
    h = _mlp_feats(x_ref[...], w1_ref[...], b1_ref[...],
                   w2_ref[...], b2_ref[...], w3_ref[...], b3_ref[...])
    mn = jnp.min(h)
    mx = jnp.max(h)
    scale = (0.95 * 2.0) / jnp.maximum(mx - mn, _SCALE_EPS)
    # ScaleToBounds offset cancels in the RBF difference; fold scale into the
    # exp coefficient instead of rescaling the feature slab.
    neg_coef = -(scale * scale) * _INV_2L2
    h_t = jnp.transpose(h)                        # small [N,10] -> [10,N]
    k_state = _additive_rbf(h, h_t, neg_coef)
    # fish_t is pre-transposed in the wrapper -> plain MXU matmul.
    k_fisher = jnp.dot(fish_ref[...], fish_t_ref[...],
                       preferred_element_type=jnp.float32)
    covar_ref[...] = sm_ref[0] * k_state + fm_ref[0] * k_fisher


# ---------------------------------------------------------------------------
# Kernel B1 (large batch): row-tiled MLP (features only; min/max reduced in XLA)
# ---------------------------------------------------------------------------
def _mlp_feats_kernel(x_ref, w1_ref, b1_ref, w2_ref, b2_ref, w3_ref, b3_ref,
                      feat_ref):
    feat_ref[...] = _mlp_feats(x_ref[...], w1_ref[...], b1_ref[...],
                               w2_ref[...], b2_ref[...], w3_ref[...], b3_ref[...])


# ---------------------------------------------------------------------------
# Kernel B2 (large batch): tiled GP covariance, upper-triangle blocks only.
#   sc_ref[0] = -(scale^2)/(2 l^2)   (ScaleToBounds folded into the exponent)
#   sc_ref[1] = state_multiplier * outputscale
#   sc_ref[2] = fisher_multiplier * variance
# ---------------------------------------------------------------------------
def _gp_covar_tile_kernel(sc_ref, feats_i_ref, feats_t_j_ref,
                          fish_i_ref, fish_t_j_ref, covar_ref):
    bi = pl.program_id(0)
    bj = pl.program_id(1)

    @pl.when(bi <= bj)                    # lower-triangle blocks mirrored in XLA
    def _():
        k_state = _additive_rbf(feats_i_ref[...], feats_t_j_ref[...], sc_ref[0])
        k_fisher = jnp.dot(fish_i_ref[...], fish_t_j_ref[...],
                           preferred_element_type=jnp.float32)
        covar_ref[...] = sc_ref[1] * k_state + sc_ref[2] * k_fisher


# ---------------------------------------------------------------------------
# Parameter init (deterministic, PyTorch-Linear-style uniform)
# ---------------------------------------------------------------------------
def init_params(key):
    def linear(k, fan_in, fan_out):
        kw, kb = jax.random.split(k)
        bound = 1.0 / (fan_in ** 0.5)
        w = jax.random.uniform(kw, (fan_in, fan_out), jnp.float32, -bound, bound)
        b = jax.random.uniform(kb, (1, fan_out), jnp.float32, -bound, bound)
        return w, b
    k1, k2, k3 = jax.random.split(key, 3)
    return {
        "affine1": linear(k1, STATE_DIM, H1),
        "affine2": linear(k2, H1, H2),
        "affine3": linear(k3, H2, NN_OUT),
    }


# ---------------------------------------------------------------------------
# Wrapper: Value.forward(x, state_multiplier, fisher_multiplier)
# ---------------------------------------------------------------------------
def _value_forward_impl(params, x, state_multiplier, fisher_multiplier):
    n = x.shape[0]
    x_state = x[:, :STATE_DIM]
    x_fisher = x[:, STATE_DIM:]
    (w1, b1) = params["affine1"]
    (w2, b2) = params["affine2"]
    (w3, b3) = params["affine3"]
    sm_s = jnp.asarray(state_multiplier, jnp.float32) * RBF_OUTPUTSCALE
    fm_s = jnp.asarray(fisher_multiplier, jnp.float32) * LIN_VARIANCE

    vmem = pl.BlockSpec(memory_space=pltpu.MemorySpace.VMEM)
    smem = pl.BlockSpec(memory_space=pltpu.MemorySpace.SMEM)

    if n <= FUSED_BATCH_MAX:
        # --- tiny-batch latency path: one fused kernel, one launch ----------
        x_fisher_t = x_fisher.T                      # XLA-side transpose (cheap)
        cost = pl.CostEstimate(
            flops=2 * n * (STATE_DIM * H1 + H1 * H2 + H2 * NN_OUT)
                  + 2 * n * n * ACTION_DIM + 6 * n * n * NN_OUT,
            transcendentals=n * (H1 + H2 + NN_OUT) + n * n * NN_OUT,
            bytes_accessed=4 * (x.size + w1.size + b1.size + w2.size + b2.size
                                + w3.size + b3.size + 2 * x_fisher.size + n * n),
        )
        covar = pl.pallas_call(
            _fused_value_kernel,
            out_shape=jax.ShapeDtypeStruct((n, n), jnp.float32),
            in_specs=[smem, smem] + [vmem] * 9,
            out_specs=vmem,
            cost_estimate=cost,
        )(sm_s.reshape(1), fm_s.reshape(1), x_state, w1, b1, w2, b2, w3, b3,
          x_fisher, x_fisher_t)
    else:
        # --- large-batch path: row-tiled MLP + symmetric tiled covariance ---
        tm = MLP_TILE
        mlp_cost = pl.CostEstimate(
            flops=2 * n * (STATE_DIM * H1 + H1 * H2 + H2 * NN_OUT),
            transcendentals=n * (H1 + H2 + NN_OUT),
            bytes_accessed=4 * (n * STATE_DIM + n * NN_OUT + w1.size + w2.size
                                + w3.size + b1.size + b2.size + b3.size),
        )
        feats = pl.pallas_call(
            _mlp_feats_kernel,
            out_shape=jax.ShapeDtypeStruct((n, NN_OUT), jnp.float32),
            grid=(pl.cdiv(n, tm),),
            in_specs=[
                pl.BlockSpec((tm, STATE_DIM), lambda i: (i, 0)),
                pl.BlockSpec((STATE_DIM, H1), lambda i: (0, 0)),
                pl.BlockSpec((1, H1), lambda i: (0, 0)),
                pl.BlockSpec((H1, H2), lambda i: (0, 0)),
                pl.BlockSpec((1, H2), lambda i: (0, 0)),
                pl.BlockSpec((H2, NN_OUT), lambda i: (0, 0)),
                pl.BlockSpec((1, NN_OUT), lambda i: (0, 0)),
            ],
            out_specs=pl.BlockSpec((tm, NN_OUT), lambda i: (i, 0)),
            compiler_params=pltpu.CompilerParams(
                dimension_semantics=("parallel",)),
            cost_estimate=mlp_cost,
        )(x_state, w1, b1, w2, b2, w3, b3)

        # Global ScaleToBounds min/max: one tiny XLA reduce over [N, 10].
        mn = jnp.min(feats)
        mx = jnp.max(feats)
        scale = (0.95 * 2.0) / jnp.maximum(mx - mn, _SCALE_EPS)
        neg_coef = -(scale * scale) * _INV_2L2
        sc = jnp.stack([neg_coef, sm_s, fm_s]).astype(jnp.float32)  # [3] scalars

        tn = COVAR_TILE
        nt = pl.cdiv(n, tn)
        n_pad = nt * tn
        pad = n_pad - n
        if pad:
            # Pad only the tiny [N,10]/[N,6] inputs; output stays (n, n) with
            # masked boundary stores (garbage rows/cols never reach valid outputs).
            feats_p = jnp.pad(feats, ((0, pad), (0, 0)))
            fish_p = jnp.pad(x_fisher, ((0, pad), (0, 0)))
        else:
            feats_p, fish_p = feats, x_fisher
        feats_t = feats_p.T                          # [NN_OUT, n_pad] (XLA side)
        fish_t = fish_p.T                            # [ACTION_DIM, n_pad]

        tiles = nt * (nt + 1) // 2                   # upper-triangle blocks only
        cov_cost = pl.CostEstimate(
            flops=tiles * (2 * tn * tn * ACTION_DIM + 6 * tn * tn * NN_OUT),
            transcendentals=tiles * tn * tn * NN_OUT,
            bytes_accessed=4 * (2 * n_pad * NN_OUT + 2 * n_pad * ACTION_DIM
                                + n * n),
        )
        smem_sc = pl.BlockSpec((3,), lambda i, j: (0,),
                               memory_space=pltpu.MemorySpace.SMEM)
        upper = pl.pallas_call(
            _gp_covar_tile_kernel,
            out_shape=jax.ShapeDtypeStruct((n, n), jnp.float32),
            grid=(nt, nt),
            in_specs=[
                smem_sc,                                             # scalars
                pl.BlockSpec((tn, NN_OUT), lambda i, j: (i, 0)),     # feats rows i
                pl.BlockSpec((NN_OUT, tn), lambda i, j: (0, j)),     # feats^T cols j
                pl.BlockSpec((tn, ACTION_DIM), lambda i, j: (i, 0)), # fisher rows i
                pl.BlockSpec((ACTION_DIM, tn), lambda i, j: (0, j)), # fisher^T cols j
            ],
            out_specs=pl.BlockSpec((tn, tn), lambda i, j: (i, j)),
            compiler_params=pltpu.CompilerParams(
                dimension_semantics=("parallel", "parallel")),
            cost_estimate=cov_cost,
        )(sc, feats_p, feats_t, fish_p, fish_t)

        # Mirror the lower triangle (kernel only wrote blocks with i <= j).
        r = jax.lax.broadcasted_iota(jnp.int32, (n, n), 0)
        c = jax.lax.broadcasted_iota(jnp.int32, (n, n), 1)
        covar = jnp.where(r <= c, upper, upper.T)

    # gpytorch ConstantMean() with default zero constant.
    mean = jnp.zeros((n,), jnp.float32)
    return mean, covar


value_forward = jax.jit(_value_forward_impl)


# ---------------------------------------------------------------------------
# Pure-JAX reference for validation
# ---------------------------------------------------------------------------
def reference(params, x, sm, fm):
    (w1, b1) = params["affine1"]
    (w2, b2) = params["affine2"]
    (w3, b3) = params["affine3"]
    h = jnp.tanh(x[:, :STATE_DIM] @ w1 + b1)
    h = jnp.tanh(h @ w2 + b2)
    h = jnp.tanh(h @ w3 + b3)
    mn, mx = h.min(), h.max()
    feats = (h - mn) * (0.95 * 2.0 / jnp.maximum(mx - mn, _SCALE_EPS)) - 0.95
    diff = feats[:, None, :] - feats[None, :, :]
    k_state = RBF_OUTPUTSCALE * jnp.sum(jnp.exp(-(diff ** 2) * _INV_2L2), axis=-1)
    fish = x[:, STATE_DIM:]
    k_fisher = LIN_VARIANCE * (fish @ fish.T)
    return jnp.zeros((x.shape[0],), jnp.float32), sm * k_state + fm * k_fisher


if __name__ == "__main__":
    key = jax.random.PRNGKey(0)
    kp, kx1, kx2 = jax.random.split(key, 3)
    params = init_params(kp)

    state_multiplier = 2.0
    fisher_multiplier = 0.5

    # --- small batch: fused single-kernel path -----------------------------
    batch_small = 8
    x_small = jax.random.normal(kx1, (batch_small, STATE_DIM + ACTION_DIM),
                                jnp.float32)
    mean_s, covar_s = value_forward(params, x_small,
                                    state_multiplier, fisher_multiplier)
    jax.block_until_ready((mean_s, covar_s))
    ref_mean_s, ref_covar_s = reference(params, x_small,
                                        state_multiplier, fisher_multiplier)
    assert mean_s.shape == (batch_small,) and covar_s.shape == (batch_small,) * 2
    assert jnp.allclose(mean_s, ref_mean_s, atol=1e-5)
    assert jnp.allclose(covar_s, ref_covar_s, atol=1e-4, rtol=1e-4)

    # --- larger batch: tiled symmetric covariance path (non-multiple of tile)
    batch_large = 640
    x_large = jax.random.normal(kx2, (batch_large, STATE_DIM + ACTION_DIM),
                                jnp.float32)
    mean_l, covar_l = value_forward(params, x_large,
                                    state_multiplier, fisher_multiplier)
    jax.block_until_ready((mean_l, covar_l))
    ref_mean_l, ref_covar_l = reference(params, x_large,
                                        state_multiplier, fisher_multiplier)
    assert mean_l.shape == (batch_large,) and covar_l.shape == (batch_large,) * 2
    assert jnp.allclose(mean_l, ref_mean_l, atol=1e-5)
    assert jnp.allclose(covar_l, ref_covar_l, atol=1e-4, rtol=1e-4)

    print("KERNEL_OK")
</pallas_src>

<mosaic_0001>
module attributes {stable_mosaic.version = 11 : i64} {
  func.func @_fused_value_kernel(%arg0: memref<1xf32, #tpu.memory_space<smem>>, %arg1: memref<1xf32, #tpu.memory_space<smem>>, %arg2: memref<8x10xf32, #tpu.memory_space<vmem>>, %arg3: memref<10x64xf32, #tpu.memory_space<vmem>>, %arg4: memref<1x64xf32, #tpu.memory_space<vmem>>, %arg5: memref<64x48xf32, #tpu.memory_space<vmem>>, %arg6: memref<1x48xf32, #tpu.memory_space<vmem>>, %arg7: memref<48x10xf32, #tpu.memory_space<vmem>>, %arg8: memref<1x10xf32, #tpu.memory_space<vmem>>, %arg9: memref<8x6xf32, #tpu.memory_space<vmem>>, %arg10: memref<6x8xf32, #tpu.memory_space<vmem>>, %arg11: memref<8x8xf32, #tpu.memory_space<vmem>>) attributes {dimension_semantics = [], scalar_prefetch = 0 : i64, scratch_operands = 0 : i64, tpu.core_type = #tpu.core_type<tc>} {
    %c0 = arith.constant 0 : index
    %c0_0 = arith.constant 0 : index
    %0 = vector.load %arg2[%c0, %c0_0] : memref<8x10xf32, #tpu.memory_space<vmem>>, vector<8x10xf32>
    %c0_1 = arith.constant 0 : index
    %c0_2 = arith.constant 0 : index
    %1 = vector.load %arg3[%c0_1, %c0_2] : memref<10x64xf32, #tpu.memory_space<vmem>>, vector<10x64xf32>
    %c0_3 = arith.constant 0 : index
    %c0_4 = arith.constant 0 : index
    %2 = vector.load %arg4[%c0_3, %c0_4] : memref<1x64xf32, #tpu.memory_space<vmem>>, vector<1x64xf32>
    %c0_5 = arith.constant 0 : index
    %c0_6 = arith.constant 0 : index
    %3 = vector.load %arg5[%c0_5, %c0_6] : memref<64x48xf32, #tpu.memory_space<vmem>>, vector<64x48xf32>
    %c0_7 = arith.constant 0 : index
    %c0_8 = arith.constant 0 : index
    %4 = vector.load %arg6[%c0_7, %c0_8] : memref<1x48xf32, #tpu.memory_space<vmem>>, vector<1x48xf32>
    %c0_9 = arith.constant 0 : index
    %c0_10 = arith.constant 0 : index
    %5 = vector.load %arg7[%c0_9, %c0_10] : memref<48x10xf32, #tpu.memory_space<vmem>>, vector<48x10xf32>
    %c0_11 = arith.constant 0 : index
    %c0_12 = arith.constant 0 : index
    %6 = vector.load %arg8[%c0_11, %c0_12] : memref<1x10xf32, #tpu.memory_space<vmem>>, vector<1x10xf32>
    %cst = arith.constant dense<0.000000e+00> : vector<8x64xf32>
    %7 = tpu.matmul %0, %1, %cst {dimension_numbers = #tpu.dot_dimension_numbers<[1], [0], [0], [1], [0, 0, 1, 1], [], []>} : vector<8x10xf32>, vector<10x64xf32>, vector<8x64xf32> -> vector<8x64xf32>
    %8 = vector.broadcast %2 : vector<1x64xf32> to vector<8x64xf32>
    %9 = arith.addf %7, %8 : vector<8x64xf32>
    %10 = math.tanh %9 : vector<8x64xf32>
    %cst_13 = arith.constant dense<0.000000e+00> : vector<8x48xf32>
    %11 = tpu.matmul %10, %3, %cst_13 {dimension_numbers = #tpu.dot_dimension_numbers<[1], [0], [0], [1], [0, 0, 1, 1], [], []>} : vector<8x64xf32>, vector<64x48xf32>, vector<8x48xf32> -> vector<8x48xf32>
    %12 = vector.broadcast %4 : vector<1x48xf32> to vector<8x48xf32>
    %13 = arith.addf %11, %12 : vector<8x48xf32>
    %14 = math.tanh %13 : vector<8x48xf32>
    %cst_14 = arith.constant dense<0.000000e+00> : vector<8x10xf32>
    %15 = tpu.matmul %14, %5, %cst_14 {dimension_numbers = #tpu.dot_dimension_numbers<[1], [0], [0], [1], [0, 0, 1, 1], [], []>} : vector<8x48xf32>, vector<48x10xf32>, vector<8x10xf32> -> vector<8x10xf32>
    %16 = vector.broadcast %6 : vector<1x10xf32> to vector<8x10xf32>
    %17 = arith.addf %15, %16 : vector<8x10xf32>
    %18 = math.tanh %17 : vector<8x10xf32>
    %19 = vector.shape_cast %18 : vector<8x10xf32> to vector<1x8x10xf32>
    %cst_15 = arith.constant dense<0x7F800000> : vector<1xf32>
    %20 = vector.multi_reduction <minimumf>, %19, %cst_15 [1, 2] : vector<1x8x10xf32> to vector<1xf32>
    %21 = vector.shape_cast %20 : vector<1xf32> to vector<1x1x1xf32>
    %22 = vector.extract %21[0, 0, 0] : f32 from vector<1x1x1xf32>
    %23 = vector.shape_cast %18 : vector<8x10xf32> to vector<1x8x10xf32>
    %cst_16 = arith.constant dense<0xFF800000> : vector<1xf32>
    %24 = vector.multi_reduction <maximumf>, %23, %cst_16 [1, 2] : vector<1x8x10xf32> to vector<1xf32>
    %25 = vector.shape_cast %24 : vector<1xf32> to vector<1x1x1xf32>
    %26 = vector.extract %25[0, 0, 0] : f32 from vector<1x1x1xf32>
    %27 = arith.subf %26, %22 : f32
    %cst_17 = arith.constant 9.99999993E-9 : f32
    %28 = arith.maximumf %27, %cst_17 : f32
    %cst_18 = arith.constant 1.900000e+00 : f32
    %29 = arith.divf %cst_18, %28 : f32
    %30 = arith.mulf %29, %29 : f32
    %cst_19 = arith.constant 0.000000e+00 : f32
    %31 = arith.subf %cst_19, %30 : f32
    %cst_20 = arith.constant 1.04068446 : f32
    %32 = arith.mulf %31, %cst_20 : f32
    %33 = tpu.transpose %18, [1, 0] : vector<8x10xf32> -> vector<10x8xf32>
    %cst_21 = arith.constant 0.000000e+00 : f32
    %34 = vector.broadcast %cst_21 : f32 to vector<8x8xf32>
    %35 = vector.extract_strided_slice %18 {offsets = [0, 0], sizes = [8, 1], strides = [1, 1]} : vector<8x10xf32> to vector<8x1xf32>
    %36 = vector.extract_strided_slice %33 {offsets = [0, 0], sizes = [1, 8], strides = [1, 1]} : vector<10x8xf32> to vector<1x8xf32>
    %37 = vector.broadcast %35 : vector<8x1xf32> to vector<8x8xf32>
    %38 = vector.broadcast %36 : vector<1x8xf32> to vector<8x8xf32>
    %39 = arith.subf %37, %38 : vector<8x8xf32>
    %40 = arith.mulf %39, %39 : vector<8x8xf32>
    %41 = vector.broadcast %32 : f32 to vector<8x8xf32>
    %42 = arith.mulf %40, %41 : vector<8x8xf32>
    %43 = math.exp %42 : vector<8x8xf32>
    %44 = arith.addf %34, %43 : vector<8x8xf32>
    %45 = vector.extract_strided_slice %18 {offsets = [0, 1], sizes = [8, 1], strides = [1, 1]} : vector<8x10xf32> to vector<8x1xf32>
    %46 = vector.extract_strided_slice %33 {offsets = [1, 0], sizes = [1, 8], strides = [1, 1]} : vector<10x8xf32> to vector<1x8xf32>
    %47 = vector.broadcast %45 : vector<8x1xf32> to vector<8x8xf32>
    %48 = vector.broadcast %46 : vector<1x8xf32> to vector<8x8xf32>
    %49 = arith.subf %47, %48 : vector<8x8xf32>
    %50 = arith.mulf %49, %49 : vector<8x8xf32>
    %51 = vector.broadcast %32 : f32 to vector<8x8xf32>
    %52 = arith.mulf %50, %51 : vector<8x8xf32>
    %53 = math.exp %52 : vector<8x8xf32>
    %54 = arith.addf %44, %53 : vector<8x8xf32>
    %55 = vector.extract_strided_slice %18 {offsets = [0, 2], sizes = [8, 1], strides = [1, 1]} : vector<8x10xf32> to vector<8x1xf32>
    %56 = vector.extract_strided_slice %33 {offsets = [2, 0], sizes = [1, 8], strides = [1, 1]} : vector<10x8xf32> to vector<1x8xf32>
    %57 = vector.broadcast %55 : vector<8x1xf32> to vector<8x8xf32>
    %58 = vector.broadcast %56 : vector<1x8xf32> to vector<8x8xf32>
    %59 = arith.subf %57, %58 : vector<8x8xf32>
    %60 = arith.mulf %59, %59 : vector<8x8xf32>
    %61 = vector.broadcast %32 : f32 to vector<8x8xf32>
    %62 = arith.mulf %60, %61 : vector<8x8xf32>
    %63 = math.exp %62 : vector<8x8xf32>
    %64 = arith.addf %54, %63 : vector<8x8xf32>
    %65 = vector.extract_strided_slice %18 {offsets = [0, 3], sizes = [8, 1], strides = [1, 1]} : vector<8x10xf32> to vector<8x1xf32>
    %66 = vector.extract_strided_slice %33 {offsets = [3, 0], sizes = [1, 8], strides = [1, 1]} : vector<10x8xf32> to vector<1x8xf32>
    %67 = vector.broadcast %65 : vector<8x1xf32> to vector<8x8xf32>
    %68 = vector.broadcast %66 : vector<1x8xf32> to vector<8x8xf32>
    %69 = arith.subf %67, %68 : vector<8x8xf32>
    %70 = arith.mulf %69, %69 : vector<8x8xf32>
    %71 = vector.broadcast %32 : f32 to vector<8x8xf32>
    %72 = arith.mulf %70, %71 : vector<8x8xf32>
    %73 = math.exp %72 : vector<8x8xf32>
    %74 = arith.addf %64, %73 : vector<8x8xf32>
    %75 = vector.extract_strided_slice %18 {offsets = [0, 4], sizes = [8, 1], strides = [1, 1]} : vector<8x10xf32> to vector<8x1xf32>
    %76 = vector.extract_strided_slice %33 {offsets = [4, 0], sizes = [1, 8], strides = [1, 1]} : vector<10x8xf32> to vector<1x8xf32>
    %77 = vector.broadcast %75 : vector<8x1xf32> to vector<8x8xf32>
    %78 = vector.broadcast %76 : vector<1x8xf32> to vector<8x8xf32>
    %79 = arith.subf %77, %78 : vector<8x8xf32>
    %80 = arith.mulf %79, %79 : vector<8x8xf32>
    %81 = vector.broadcast %32 : f32 to vector<8x8xf32>
    %82 = arith.mulf %80, %81 : vector<8x8xf32>
    %83 = math.exp %82 : vector<8x8xf32>
    %84 = arith.addf %74, %83 : vector<8x8xf32>
    %85 = vector.extract_strided_slice %18 {offsets = [0, 5], sizes = [8, 1], strides = [1, 1]} : vector<8x10xf32> to vector<8x1xf32>
    %86 = vector.extract_strided_slice %33 {offsets = [5, 0], sizes = [1, 8], strides = [1, 1]} : vector<10x8xf32> to vector<1x8xf32>
    %87 = vector.broadcast %85 : vector<8x1xf32> to vector<8x8xf32>
    %88 = vector.broadcast %86 : vector<1x8xf32> to vector<8x8xf32>
    %89 = arith.subf %87, %88 : vector<8x8xf32>
    %90 = arith.mulf %89, %89 : vector<8x8xf32>
    %91 = vector.broadcast %32 : f32 to vector<8x8xf32>
    %92 = arith.mulf %90, %91 : vector<8x8xf32>
    %93 = math.exp %92 : vector<8x8xf32>
    %94 = arith.addf %84, %93 : vector<8x8xf32>
    %95 = vector.extract_strided_slice %18 {offsets = [0, 6], sizes = [8, 1], strides = [1, 1]} : vector<8x10xf32> to vector<8x1xf32>
    %96 = vector.extract_strided_slice %33 {offsets = [6, 0], sizes = [1, 8], strides = [1, 1]} : vector<10x8xf32> to vector<1x8xf32>
    %97 = vector.broadcast %95 : vector<8x1xf32> to vector<8x8xf32>
    %98 = vector.broadcast %96 : vector<1x8xf32> to vector<8x8xf32>
    %99 = arith.subf %97, %98 : vector<8x8xf32>
    %100 = arith.mulf %99, %99 : vector<8x8xf32>
    %101 = vector.broadcast %32 : f32 to vector<8x8xf32>
    %102 = arith.mulf %100, %101 : vector<8x8xf32>
    %103 = math.exp %102 : vector<8x8xf32>
    %104 = arith.addf %94, %103 : vector<8x8xf32>
    %105 = vector.extract_strided_slice %18 {offsets = [0, 7], sizes = [8, 1], strides = [1, 1]} : vector<8x10xf32> to vector<8x1xf32>
    %106 = vector.extract_strided_slice %33 {offsets = [7, 0], sizes = [1, 8], strides = [1, 1]} : vector<10x8xf32> to vector<1x8xf32>
    %107 = vector.broadcast %105 : vector<8x1xf32> to vector<8x8xf32>
    %108 = vector.broadcast %106 : vector<1x8xf32> to vector<8x8xf32>
    %109 = arith.subf %107, %108 : vector<8x8xf32>
    %110 = arith.mulf %109, %109 : vector<8x8xf32>
    %111 = vector.broadcast %32 : f32 to vector<8x8xf32>
    %112 = arith.mulf %110, %111 : vector<8x8xf32>
    %113 = math.exp %112 : vector<8x8xf32>
    %114 = arith.addf %104, %113 : vector<8x8xf32>
    %115 = vector.extract_strided_slice %18 {offsets = [0, 8], sizes = [8, 1], strides = [1, 1]} : vector<8x10xf32> to vector<8x1xf32>
    %116 = vector.extract_strided_slice %33 {offsets = [8, 0], sizes = [1, 8], strides = [1, 1]} : vector<10x8xf32> to vector<1x8xf32>
    %117 = vector.broadcast %115 : vector<8x1xf32> to vector<8x8xf32>
    %118 = vector.broadcast %116 : vector<1x8xf32> to vector<8x8xf32>
    %119 = arith.subf %117, %118 : vector<8x8xf32>
    %120 = arith.mulf %119, %119 : vector<8x8xf32>
    %121 = vector.broadcast %32 : f32 to vector<8x8xf32>
    %122 = arith.mulf %120, %121 : vector<8x8xf32>
    %123 = math.exp %122 : vector<8x8xf32>
    %124 = arith.addf %114, %123 : vector<8x8xf32>
    %125 = vector.extract_strided_slice %18 {offsets = [0, 9], sizes = [8, 1], strides = [1, 1]} : vector<8x10xf32> to vector<8x1xf32>
    %126 = vector.extract_strided_slice %33 {offsets = [9, 0], sizes = [1, 8], strides = [1, 1]} : vector<10x8xf32> to vector<1x8xf32>
    %127 = vector.broadcast %125 : vector<8x1xf32> to vector<8x8xf32>
    %128 = vector.broadcast %126 : vector<1x8xf32> to vector<8x8xf32>
    %129 = arith.subf %127, %128 : vector<8x8xf32>
    %130 = arith.mulf %129, %129 : vector<8x8xf32>
    %131 = vector.broadcast %32 : f32 to vector<8x8xf32>
    %132 = arith.mulf %130, %131 : vector<8x8xf32>
    %133 = math.exp %132 : vector<8x8xf32>
    %134 = arith.addf %124, %133 : vector<8x8xf32>
    %c0_22 = arith.constant 0 : index
    %c0_23 = arith.constant 0 : index
    %135 = vector.load %arg9[%c0_22, %c0_23] : memref<8x6xf32, #tpu.memory_space<vmem>>, vector<8x6xf32>
    %c0_24 = arith.constant 0 : index
    %c0_25 = arith.constant 0 : index
    %136 = vector.load %arg10[%c0_24, %c0_25] : memref<6x8xf32, #tpu.memory_space<vmem>>, vector<6x8xf32>
    %cst_26 = arith.constant dense<0.000000e+00> : vector<8x8xf32>
    %137 = tpu.matmul %135, %136, %cst_26 {dimension_numbers = #tpu.dot_dimension_numbers<[1], [0], [0], [1], [0, 0, 1, 1], [], []>} : vector<8x6xf32>, vector<6x8xf32>, vector<8x8xf32> -> vector<8x8xf32>
    %c0_27 = arith.constant 0 : index
    %138 = memref.load %arg0[%c0_27] : memref<1xf32, #tpu.memory_space<smem>>
    %139 = vector.broadcast %138 : f32 to vector<8x8xf32>
    %140 = arith.mulf %139, %134 : vector<8x8xf32>
    %c0_28 = arith.constant 0 : index
    %141 = memref.load %arg1[%c0_28] : memref<1xf32, #tpu.memory_space<smem>>
    %142 = vector.broadcast %141 : f32 to vector<8x8xf32>
    %143 = arith.mulf %142, %137 : vector<8x8xf32>
    %144 = arith.addf %140, %143 : vector<8x8xf32>
    %c0_29 = arith.constant 0 : index
    %c0_30 = arith.constant 0 : index
    %145 = vector.load %arg11[%c0_29, %c0_30] : memref<8x8xf32, #tpu.memory_space<vmem>>, vector<8x8xf32>
    tpu.vector_store %arg11[%c0_29, %c0_30], %144 {strides = array<i32>} : memref<8x8xf32, #tpu.memory_space<vmem>>, vector<8x8xf32>,
    return
  }
}

</mosaic_0001>

<bundles_post_ra>
// kernel: _value_forward_impl.1
= control target key start
LH: loop header
LB: loop body
LE: loop exit
PB: predicated region body
PF: predicated region fallthrough
CT: control target
= control target key end

     0   :  { %vm71_vm0 = vcmask 1041408   ;;  %v771_v1 = vmov 0.0   ;;  %vm772_vm1 = vmmov 0   ;;  %s951_s0 = inlined_call_operand.<no memory space> [shape: f32[1], index: 0, kind: input, shape index: {}]   ;;  %s952_s1 = inlined_call_operand.<no memory space> [shape: f32[1], index: 1, kind: input, shape index: {}]   ;;  %s953_s2 = inlined_call_operand.vmem [shape: f32[8,10], index: 2, kind: input, shape index: {}]   ;;  %s954_s3 = inlined_call_operand.vmem [shape: f32[10,64], index: 3, kind: input, shape index: {}]   ;;  %s955_s4 = inlined_call_operand.vmem [shape: f32[1,64], index: 4, kind: input, shape index: {}]   ;;  %s956_s5 = inlined_call_operand.vmem [shape: f32[64,48], index: 5, kind: input, shape index: {}]   ;;  %s957_s6 = inlined_call_operand.vmem [shape: f32[1,48], index: 6, kind: input, shape index: {}]   ;;  %s958_s7 = inlined_call_operand.vmem [shape: f32[48,10], index: 7, kind: input, shape index: {}]   ;;  %s959_s8 = inlined_call_operand.vmem [shape: f32[1,10], index: 8, kind: input, shape index: {}]   ;;  %s960_s9 = inlined_call_operand.vmem [shape: f32[8,6], index: 9, kind: input, shape index: {}]   ;;  %s961_s10 = inlined_call_operand.vmem [shape: f32[6,8], index: 10, kind: input, shape index: {}]   ;;  %s962_s11 = inlined_call_operand.hbm [shape: f32[8,8], index: 11, kind: output, shape index: {}]  }
   0x1   :  { %v43_v0 = vld [vmem:[%s954_s3 + $0x8] sm:$0x3]  ;;  %644 = vmatprep.subr.mxu0 %v771_v1  ;;  %v42_v2 = vld [vmem:[%s954_s3] sm:$0xff]  ;;  %648 = vmatprep.mubr.msk.f32.mxu0 %vm772_vm1, %v771_v1 }
   0x2   :  { %18 = vsyncpa [#allocation5], 0  ;;  %645 = vmatpush3.msk.msra.mxu0 %vm71_vm0, %v43_v0  ;;  %v41_v3 = vld [vmem:[%s953_s2] sm:$0xff]  ;;  %vm67_vm2 = vcmask 80896   ;;  %651 = vmatprep.subr.mxu1 %v771_v1  ;;  %v52_v4 = vld [vmem:[%s956_s5 + $0x38] sm:$0xff]  ;;  %vm152_vm3 = vcmask 523264  }
   0x3   :  { %646 = vmatprep.subr.mxu0 %v771_v1  ;;  %667 = vmatprep.mubr.msk.f32.mxu1 %vm772_vm1, %v771_v1  ;;  %v51_v5 = vld [vmem:[%s956_s5 + $0x30] sm:$0xff]  ;;  %v50_v6 = vld [vmem:[%s956_s5 + $0x28] sm:$0xff]  ;;  %v49_v7 = vld [vmem:[%s956_s5 + $0x20] sm:$0xff]  ;;  %vm233_vm4 = vcmask 392192   ;;  %v773_v28 = vmov 0   ;;  %v774_v29 = vmov 2  }
   0x4   :  { %647 = vmatpush3.msra.mxu0 %v42_v2  ;;  %652 = vmatpush3.msra.mxu1 %v52_v4  ;;  %v48_v8 = vld [vmem:[%s956_s5 + $0x18] sm:$0xff]  ;;  %v47_v9 = vld [vmem:[%s956_s5 + $0x10] sm:$0xff]  ;;  %v46_v10 = vld [vmem:[%s956_s5 + $0x8] sm:$0xff]  ;;  %vm517_vm5 = vcmask 1045504   ;;  %vm513_vm6 = vcmask 48128   ;;  %v775_v38 = vmov 1  }
   0x5   :  { %649 = vmatmul.mubr.msk.f32.vlgmr.msra.gmra.mxu0 %vm67_vm2, %v41_v3  ;;  %670 = vmatprep.subr.mxu0 %v771_v1  ;;  %v45_v11 = vld [vmem:[%s956_s5] sm:$0xff]  ;;  %v59_v17 = vld [vmem:[%s958_s7 + $0x28] sm:$0xff]  ;;  %v57_v19 = vld [vmem:[%s958_s7 + $0x18] sm:$0xff]  ;;  %v776_v40 = vmov 3   ;;  %v777_v41 = vmov 4   ;;  %v778_v42 = vmov 5  }
   0x6   :  { %682 = vmatprep.mubr.msk.f32.mxu0 %vm772_vm1, %v771_v1  ;;  %653 = vmatprep.subr.mxu1 %v771_v1  ;;  %v614_v12 = vld [vmem:[%s955_s4] ss:$0 sm:$0xff]  ;;  %v56_v20 = vld [vmem:[%s958_s7 + $0x10] sm:$0xff]  ;;  %v55_v21 = vld [vmem:[%s958_s7 + $0x8] sm:$0xff]  ;;  %v779_v43 = vmov 6   ;;  %v780_v44 = vmov 7  }
   0x7   :  { %654 = vmatpush3.msra.mxu1 %v51_v5  ;;  %v58_v18 = vld [vmem:[%s958_s7 + $0x20] sm:$0xff]  ;;  %671 = vmatpush3.msra.mxu0 %v59_v17  ;;  %v781_v45 = vmov 9   ;;  %v782_v46 = vmov 8   ;;  %s783_s15 = smov 1e-08   ;;  %s784_s23 = smov [#allocation4]  }
   0x8   :  { %655 = vmatprep.subr.mxu1 %v771_v1  ;;  %672 = vmatprep.subr.mxu0 %v771_v1  ;;  %v54_v22 = vld [vmem:[%s958_s7] sm:$0xff]  ;;  %s606_s2 = sshll.u32 %s784_s23, 4  ;;  %vm598_vm7 = vcmask 64512   ;;  %s607_s2 = int_to_ptr.vmem [resolvable:$true] %s606_s2 }
   0x9   :  { %656 = vmatpush3.msra.mxu1 %v50_v6  ;;  %673 = vmatpush3.msra.mxu0 %v58_v18  ;;  %v617_v23 = vld [vmem:[%s957_s6] ss:$0 sm:$0xff]  ;;  %s749_s24 = scalar_lea.vmem %s607_s2, 128  ;;  %p754_p1 = scmp.lt.s32.totalorder %s607_s2, %s607_s2 }
   0xa   :  { %657 = vmatprep.subr.mxu1 %v771_v1  ;;  %674 = vmatprep.subr.mxu0 %v771_v1  ;;  %v512_v30 = vld [vmem:[%s961_s10] sm:$0x3f]  ;;  %p750_p0 = scmp.ne.s32.totalorder %s607_s2, %s749_s24  ;;  %p755_p2 = scmp.lt.s32.totalorder %s749_s24, %s749_s24 }
   0xb   :  { %658 = vmatpush3.msra.mxu1 %v49_v7  ;;  %675 = vmatpush3.msra.mxu0 %v57_v19  ;;  %v511_v31 = vld [vmem:[%s960_s9] sm:$0xff] }
   0xc   :  { %659 = vmatprep.subr.mxu1 %v771_v1  ;;  %676 = vmatprep.subr.mxu0 %v771_v1  ;;  %v619_v32 = vld [vmem:[%s959_s8] ss:$0 sm:$0xff]  ;;  %p756_p3 = por %p755_p2, %p754_p1 }
   0xd   :  { %660 = vmatpush3.msra.mxu1 %v48_v8  ;;  %677 = vmatpush3.msra.mxu0 %v56_v20 }
   0xe   :  { %661 = vmatprep.subr.mxu1 %v771_v1  ;;  %678 = vmatprep.subr.mxu0 %v771_v1  ;;  %p757_p4 = pnand %p756_p3, %p750_p0 }
   0xf   :  { %662 = vmatpush3.msra.mxu1 %v47_v9  ;;  %679 = vmatpush3.msra.mxu0 %v55_v21  ;;  %v374_v9 = vlaneseq }
  0x10   :  { %663 = vmatprep.subr.mxu1 %v771_v1  ;;  %680 = vmatprep.subr.mxu0 %v771_v1 }
  0x11   :  { %664 = vmatpush3.msra.mxu1 %v46_v10  ;;  %681 = vmatpush3.msra.mxu0 %v54_v22  ;;  %v375_v10 = vshrl.u32 %v374_v9, 7 }
  0x12   :  { %665 = vmatprep.subr.mxu1 %v771_v1  ;;  %685 = vmatprep.subr.mxu0 %v771_v1 }
  0x13   :  { %666 = vmatpush3.msra.mxu1 %v45_v11  ;;  %710 = vset.pattern.permute.xlu1 %v773_v28  ;;  %v433_v17 = vsub.s32 4, %v375_v10  ;;  %v447_v21 = vsub.s32 5, %v375_v10 }
  0x14   :  { %712 = vset.pattern.permute.xlu0 %v774_v29 }
  0xc5   :  { %v141_v13 = vpop.f32.mrf.mxu0 }
  0xc6   :  { %v142_v14 = vadd.f32 %v614_v12, %v141_v13  ;;  %v405_v12 = vsub.s32 2, %v375_v10  ;;  %v376_v13 = vsub.s32 0, %v375_v10 }
  0xc7   :  { %v650_v15 = vpop.f32.mrf.mxu0 }
  0xc8   :  { %721 = vtanh.f32 %v142_v14  ;;  %v391_v14 = vsub.s32 1, %v375_v10  ;;  %v419_v15 = vsub.s32 3, %v375_v10 }
  0xd5   :  { %v722_v16 = vpop.eup %721 }
  0xd6   :  { %668 = vmatmul.mubr.msk.f32.vlgmr.msra.gmra.mxu1 %vm152_vm3, %v722_v16 }
 0x196   :  { %v222_v24 = vpop.f32.mrf.mxu1 }
 0x197   :  { %v223_v25 = vadd.f32 %v617_v23, %v222_v24  ;;  %v461_v23 = vsub.s32 6, %v375_v10 }
 0x198   :  { %v669_v26 = vpop.f32.mrf.mxu1 }
 0x199   :  { %723 = vtanh.f32 %v223_v25  ;;  %v475_v26 = vsub.s32 7, %v375_v10 }
 0x1a6   :  { %v724_v27 = vpop.eup %723 }
 0x1a7   :  { %683 = vmatmul.mubr.msk.f32.vlgmr.msra.gmra.mxu0 %vm233_vm4, %v724_v27 }
 0x1a8   :  { %687 = vmatprep.mubr.msk.f32.mxu0 %vm772_vm1, %v771_v1  ;;  %686 = vmatpush3.msk.msra.mxu0 %vm517_vm5, %v512_v30 }
 0x1ab   :  { %688 = vmatmul.mubr.msk.f32.vlgmr.msra.gmra.mxu0 %vm513_vm6, %v511_v31 }
 0x267   :  { %v303_v33 = vpop.f32.mrf.mxu0 }
 0x268   :  { %v304_v34 = vadd.f32 %v619_v32, %v303_v33 }
 0x269   :  { %v684_v35 = vpop.f32.mrf.mxu0 }
 0x26a   :  { %725 = vtanh.f32 %v304_v34 }
 0x26b   :  { %v939_v61 = vpop.f32.mrf.mxu0 }
 0x26d   :  { %v689_v62 = vpop.f32.mrf.mxu0 }
 0x277   :  { %v726_v36 = vpop.eup %725 }
 0x278   :  { %371 = vperm.xlu1 %710, %v726_v36   ;;  %v308_v37 = vsel %vm67_vm2, %v726_v36, inf  ;;  %v318_v39 = vsel %vm67_vm2, %v726_v36, -inf }
 0x279   :  { %309 = vmin.xlane.f32.xlu0 %v308_v37 }
 0x27c   :  { %711 = vset.pattern.permute.xlu1 %v775_v38 }
 0x27d   :  { %386 = vperm.xlu1 %711, %v726_v36   ;;  %319 = vmax.xlane.f32.xlu0 %v318_v39 }
 0x281   :  { %713 = vset.pattern.permute.xlu1 %v776_v40 }
 0x282   :  { %414 = vperm.xlu1 %713, %v726_v36  }
 0x286   :  { %714 = vset.pattern.permute.xlu1 %v777_v41 }
 0x287   :  { %428 = vperm.xlu1 %714, %v726_v36  }
 0x28b   :  { %715 = vset.pattern.permute.xlu1 %v778_v42 }
 0x28c   :  { %442 = vperm.xlu1 %715, %v726_v36  }
 0x290   :  { %716 = vset.pattern.permute.xlu1 %v779_v43 }
 0x291   :  { %456 = vperm.xlu1 %716, %v726_v36  }
 0x293   :  { %400 = vperm.xlu0 %712, %v726_v36  }
 0x295   :  { %717 = vset.pattern.permute.xlu1 %v780_v44 }
 0x296   :  { %470 = vperm.xlu1 %717, %v726_v36  }
 0x297   :  { %720 = vset.pattern.permute.xlu0 %v781_v45 }
 0x29a   :  { %718 = vset.pattern.permute.xlu1 %v782_v46 }
 0x29b   :  { %484 = vperm.xlu1 %718, %v726_v36  }
 0x29f   :  { %719 = vset.pattern.permute.xlu1 %v781_v45 }
 0x2a0   :  { %498 = vperm.xlu1 %719, %v726_v36  }
 0x2c9   :  { %337 = vxpose.xlu1.b32.start.end [1/1] (short) (narrow) %v726_v36, 16 }
 0x2f3   :  { %v372_v0 = vpop.permute.xlu1 %371 }
 0x2f8   :  { %v387_v2 = vpop.permute.xlu1 %386 }
 0x2fd   :  { %v415_v3 = vpop.permute.xlu1 %414 }
 0x302   :  { %v310_v47 = vpop.xlane.xlu0 %309  ;;  %v429_v4 = vpop.permute.xlu1 %428 }
 0x303   :  { %v311_v48 = vrot.slane %v310_v47, 4 }
 0x305   :  { %v312_v49 = vmin.f32 %v310_v47, %v311_v48 }
 0x306   :  { %v320_v50 = vpop.xlane.xlu0 %319 }
 0x307   :  { %v313_v51 = vrot.slane %v312_v49, 2  ;;  %v321_v52 = vrot.slane %v320_v50, 4  ;;  %v443_v5 = vpop.permute.xlu1 %442 }
 0x309   :  { %v322_v53 = vmax.f32 %v320_v50, %v321_v52  ;;  %v314_v54 = vmin.f32 %v312_v49, %v313_v51 }
 0x30b   :  { %v323_v55 = vrot.slane %v322_v53, 2  ;;  %v315_v56 = vrot.slane %v314_v54, 1 }
 0x30c   :  { %v457_v6 = vpop.permute.xlu1 %456 }
 0x30d   :  { %v316_v57 = vmin.f32 %v314_v54, %v315_v56  ;;  %v324_v58 = vmax.f32 %v322_v53, %v323_v55 }
 0x30e   :  { %v401_v24 = vpop.permute.xlu0 %400 }
 0x30f   :  { %690 = vpush %v316_v57  ;;  %v325_v59 = vrot.slane %v324_v58, 1 }
 0x311   :  { %v326_v60 = vmax.f32 %v324_v58, %v325_v59  ;;  %v471_v7 = vpop.permute.xlu1 %470 }
 0x313   :  { %692 = vpush %v326_v60 }
 0x316   :  { %v485_v8 = vpop.permute.xlu1 %484 }
 0x31b   :  { %v499_v11 = vpop.permute.xlu1 %498 }
 0x340   :  { %s691_s8 = spop %690 }
 0x344   :  { %s693_s9 = spop %692 }
 0x345   :  { %s328_s10 = ssub.f32 %s693_s9, %s691_s8  ;;  %v353_v16 = vpop.trf.xlu1 }
 0x346   :  { %v406_v18 = vrot.slane %v353_v16, %v405_v12  ;;  %v377_v19 = vrot.slane %v353_v16, %v376_v13  ;;  %v392_v20 = vrot.slane %v353_v16, %v391_v14  ;;  %v420_v22 = vrot.slane %v353_v16, %v419_v15 }
 0x347   :  { %s329_s16 = smax.f32 %s783_s15, %s328_s10  ;;  %v434_v25 = vrot.slane %v353_v16, %v433_v17  ;;  %v448_v31 = vrot.slane %v353_v16, %v447_v21  ;;  %v462_v32 = vrot.slane %v353_v16, %v461_v23  ;;  %v476_v35 = vrot.slane %v353_v16, %v475_v26 }
 0x348   :  { %v330_v63 = vstv %s329_s16  ;;  %v407_v27 = vsub.f32 %v401_v24, %v406_v18  ;;  %v378_v28 = vsub.f32 %v372_v0, %v377_v19  ;;  %v393_v29 = vsub.f32 %v387_v2, %v392_v20 }
 0x349   :  { %727 = vrcp.f32 %v330_v63  ;;  %v421_v30 = vsub.f32 %v415_v3, %v420_v22  ;;  %v435_v33 = vsub.f32 %v429_v4, %v434_v25  ;;  %v354_v38 = vpop.trf.xlu1  ;;  %v449_v40 = vsub.f32 %v443_v5, %v448_v31 }
 0x34a   :  { %v408_v34 = vmul.f32 %v407_v27, %v407_v27  ;;  %v379_v36 = vmul.f32 %v378_v28, %v378_v28  ;;  %v394_v37 = vmul.f32 %v393_v29, %v393_v29  ;;  %v463_v42 = vsub.f32 %v457_v6, %v462_v32 }
 0x34b   :  { %v422_v39 = vmul.f32 %v421_v30, %v421_v30  ;;  %v436_v46 = vmul.f32 %v435_v33, %v435_v33  ;;  %v490_v47 = vrot.slane %v354_v38, %v376_v13  ;;  %v477_v49 = vsub.f32 %v471_v7, %v476_v35 }
 0x34c   :  { %v450_v52 = vmul.f32 %v449_v40, %v449_v40  ;;  %v504_v53 = vrot.slane %v354_v38, %v391_v14  ;;  %v464_v56 = vmul.f32 %v463_v42, %v463_v42  ;;  %v595_v27 = vstv %s952_s1 }
 0x34d   :  { %v491_v57 = vsub.f32 %v485_v8, %v490_v47  ;;  %v478_v60 = vmul.f32 %v477_v49, %v477_v49  ;;  %v592_v30 = vstv %s951_s0  ;;  %v596_v32 = vmul.f32 %v595_v27, %v939_v61 }
 0x34e   :  { %v505_v62 = vsub.f32 %v499_v11, %v504_v53 }
 0x350   :  { %v506_v4 = vmul.f32 %v505_v62, %v505_v62 }
 0x356   :  { %v728_v1 = vpop.eup %727 }
 0x357   :  { %694 = vpush %v728_v1  ;;  %v492_v1 = vmul.f32 %v491_v57, %v491_v57 }
 0x388   :  { %s695_s17 = spop %694 }
 0x389   :  { %s333_s18 = smul.f32 1.9, %s695_s17 }
 0x38b   :  { %s334_s19 = smul.f32 %s333_s18, %s333_s18 }
 0x38d   :  { %s335_s20 = ssub.f32 0.0, %s334_s19 }
 0x38f   :  { %s336_s21 = smul.f32 1.0406845, %s335_s20 }
 0x391   :  { %v380_v41 = vstv %s336_s21 }
 0x392   :  { %v381_v43 = vmul.f32 %v380_v41, %v379_v36  ;;  %v395_v44 = vmul.f32 %v394_v37, %v380_v41  ;;  %v409_v45 = vmul.f32 %v408_v34, %v380_v41  ;;  %v423_v48 = vmul.f32 %v422_v39, %v380_v41 }
 0x393   :  { %v437_v55 = vmul.f32 %v436_v46, %v380_v41  ;;  %v451_v59 = vmul.f32 %v450_v52, %v380_v41  ;;  %v465_v0 = vmul.f32 %v464_v56, %v380_v41  ;;  %v479_v3 = vmul.f32 %v478_v60, %v380_v41 }
 0x394   :  { %v382_v50 = vmul.f32 1.442695, %v381_v43  ;;  %v396_v51 = vmul.f32 1.442695, %v395_v44  ;;  %v410_v54 = vmul.f32 1.442695, %v409_v45  ;;  %v493_v6 = vmul.f32 %v492_v1, %v380_v41 }
 0x395   :  { %v424_v58 = vmul.f32 1.442695, %v423_v48  ;;  %v438_v63 = vmul.f32 1.442695, %v437_v55  ;;  %v452_v2 = vmul.f32 1.442695, %v451_v59  ;;  %v507_v9 = vmul.f32 %v506_v4, %v380_v41 }
 0x396   :  { %729 = vpow2.f32 %v382_v50  ;;  %v466_v5 = vmul.f32 1.442695, %v465_v0  ;;  %v480_v7 = vmul.f32 1.442695, %v479_v3  ;;  %v494_v8 = vmul.f32 1.442695, %v493_v6 }
 0x397   :  { %731 = vpow2.f32 %v396_v51  ;;  %v508_v12 = vmul.f32 1.442695, %v507_v9 }
 0x398   :  { %733 = vpow2.f32 %v410_v54 }
 0x399   :  { %735 = vpow2.f32 %v424_v58 }
 0x39a   :  { %737 = vpow2.f32 %v438_v63 }
 0x39b   :  { %739 = vpow2.f32 %v452_v2 }
 0x39c   :  { %741 = vpow2.f32 %v466_v5 }
 0x39d   :  { %743 = vpow2.f32 %v480_v7 }
 0x39e   :  { %745 = vpow2.f32 %v494_v8 }
 0x39f   :  { %747 = vpow2.f32 %v508_v12 }
 0x3a3   :  { %v730_v10 = vpop.eup %729 }
 0x3a4   :  { %v732_v11 = vpop.eup %731 }
 0x3a5   :  { %v398_v13 = vadd.f32 %v732_v11, %v730_v10  ;;  %v734_v14 = vpop.eup %733 }
 0x3a6   :  { %v736_v16 = vpop.eup %735 }
 0x3a7   :  { %v412_v15 = vadd.f32 %v734_v14, %v398_v13  ;;  %v738_v18 = vpop.eup %737 }
 0x3a8   :  { %v740_v20 = vpop.eup %739 }
 0x3a9   :  { %v426_v17 = vadd.f32 %v736_v16, %v412_v15  ;;  %v742_v22 = vpop.eup %741 }
 0x3aa   :  { %v744_v24 = vpop.eup %743 }
 0x3ab   :  { %v440_v19 = vadd.f32 %v738_v18, %v426_v17  ;;  %v746_v26 = vpop.eup %745 }
 0x3ac   :  { %v748_v29 = vpop.eup %747 }
 0x3ad   :  { %v454_v21 = vadd.f32 %v740_v20, %v440_v19 }
 0x3af   :  { %v468_v23 = vadd.f32 %v742_v22, %v454_v21 }
 0x3b1   :  { %v482_v25 = vadd.f32 %v744_v24, %v468_v23 }
 0x3b3   :  { %v496_v28 = vadd.f32 %v746_v26, %v482_v25 }
 0x3b5   :  { %v510_v31 = vadd.f32 %v748_v29, %v496_v28 }
 0x3b7   :  { %v593_v33 = vmul.f32 %v592_v30, %v510_v31 }
 0x3b9   :  { %v597_v34 = vadd.f32 %v596_v32, %v593_v33 }
 0x3bb   :  { %599 = vst.msk [vmem:[#allocation4] sm:$0xff] %vm598_vm7, %v597_v34 }
 0x3bc   :  { %760 = shalt.err (!%p757_p4)
}
 0x3bd   :  { %609 = dma.vmem_to_hbm [thread:$0]  %s607_s2, 128, %s962_s11, [#allocation5]  }
 0x3be   :  { %769 = dma.done.wait [#allocation5], 128  }
 0x3bf   :  { %770 = vsyncadd [#allocation5], 4294967168 }
 0x3c0   :  { %613 = vsyncpa [#allocation5], 1 }

</bundles_post_ra>
